<compile_context>
chip_gen: v6e
topology: v6e:2x2x1
jax: 0.10.0
libtpu: 0.0.40
codegen_flags: <defaults>
</compile_context>

<pallas_src>
import numpy as np
import jax
import jax.numpy as jnp
from jax.experimental import pallas as pl
from jax.experimental.pallas import tpu as pltpu


# ---------------------------------------------------------------------------
# Minimal Irreps bookkeeping (dims only; enough to reproduce Extract slicing).
# Each entry is (mul, l); dim of entry = mul * (2l + 1).
# ---------------------------------------------------------------------------
class Irreps:
    def __init__(self, entries):
        self.entries = list(entries)

    @property
    def dims(self):
        return [mul * (2 * l + 1) for (mul, l) in self.entries]

    @property
    def dim(self):
        return sum(self.dims)

    def __len__(self):
        return len(self.entries)

    def slice_of(self, idx):
        start = sum(self.dims[:idx])
        return start, start + self.dims[idx]

    def slices(self):
        return [self.slice_of(i) for i in range(len(self.entries))]


# ---------------------------------------------------------------------------
# Static copy plan (mirrors the code generated by e3nn's Extract.__init__),
# with adjacent-range coalescing.
# ---------------------------------------------------------------------------
def build_extract_plan(irreps_in, irreps_outs, instructions):
    assert len(irreps_outs) == len(instructions)
    plans = []
    for irreps_out, ins in zip(irreps_outs, instructions):
        assert len(irreps_out) == len(ins)
        if tuple(ins) == tuple(range(len(irreps_in))):
            plans.append("identity")
            continue
        raw = []
        for (o1, o2), i_in in zip(irreps_out.slices(), ins):
            i1, i2 = irreps_in.slice_of(i_in)
            assert (o2 - o1) == (i2 - i1), "irrep dim mismatch in instruction"
            raw.append((o1, o2, i1, i2))
        # Coalesce adjacent copies (contiguous in both output and input).
        merged = []
        for seg in raw:
            if merged and merged[-1][1] == seg[0] and merged[-1][3] == seg[2]:
                p = merged[-1]
                merged[-1] = (p[0], seg[1], p[2], seg[3])
            else:
                merged.append(seg)
        plans.append(tuple(merged))
    return tuple(plans)


def _plan_fully_covers(plan, d_out):
    """True iff the plan's output slices tile [0, d_out) contiguously, in order."""
    if plan == "identity":
        return True
    pos = 0
    for (o1, o2, _, _) in plan:
        if o1 != pos:
            return False
        pos = o2
    return pos == d_out


# ---------------------------------------------------------------------------
# Pallas kernel: only the non-identity outputs pass through the kernel.
# All plan decisions are made at trace time (static Python), so the emitted
# code for each output is a small fixed sequence of copies.
# ---------------------------------------------------------------------------
def _make_extract_kernel(plans, dims_out):
    def kernel(x_ref, *out_refs):
        for out_ref, plan, d_out in zip(out_refs, plans, dims_out):
            if _plan_fully_covers(plan, d_out):
                if len(plan) == 1:
                    # Whole output is one contiguous input slice: one full store.
                    _, _, i1, i2 = plan[0]
                    out_ref[...] = x_ref[:, i1:i2]
                else:
                    # Gather the input slices in VMEM and do a single full-tile
                    # store (avoids a chain of masked sub-lane partial stores).
                    out_ref[...] = jnp.concatenate(
                        [x_ref[:, i1:i2] for (_, _, i1, i2) in plan], axis=-1)
            else:
                # Defensive only: real e3nn plans always fully cover the output,
                # so this path is statically skipped (no dead zero-store traffic).
                out_ref[...] = jnp.zeros_like(out_ref)
                for (o1, o2, i1, i2) in plan:
                    out_ref[:, o1:o2] = x_ref[:, i1:i2]
    return kernel


# Sublane packing per itemsize (f32 -> 8, bf16 -> 16, int8/fp8 -> 32).
_SUBLANE_PACK = {4: 8, 2: 16, 1: 32}


def _choose_batch_tile(n, per_row_vmem_bytes, pack, requested=None):
    if requested is None:
        # Double-buffered (in + outs) data budget kept well under the scoped
        # VMEM defaults of every generation (v7x has only 64 MiB total VMEM).
        budget = 24 * 1024 * 1024
        bt = budget // (2 * max(per_row_vmem_bytes, 1))
    else:
        bt = int(requested)
    # Keep at least 2 grid steps when possible so the parallel batch axis can
    # shard across v7x's two TensorCores.
    bt = min(bt, max(pl.cdiv(n, 2), pack))
    # Round to the sublane packing multiple for this dtype.
    bt = max(pack, (bt // pack) * pack)
    return int(bt)


def extract_pallas(x, irreps_in, irreps_outs, instructions, *,
                   batch_tile=None, use_pallas=None):
    plans = build_extract_plan(irreps_in, irreps_outs, instructions)

    lead_shape = x.shape[:-1]
    d_in = x.shape[-1]
    assert d_in == irreps_in.dim, f"last dim {d_in} != irreps_in.dim {irreps_in.dim}"

    n = int(np.prod(lead_shape)) if lead_shape else 1
    x2 = x.reshape(n, d_in)
    itemsize = jnp.dtype(x.dtype).itemsize
    pack = _SUBLANE_PACK.get(itemsize, 8)

    # Identity (full passthrough) outputs are short-circuited in the wrapper:
    # no extra HBM read/write of x through the kernel.
    kernel_idx = [i for i, p in enumerate(plans) if p != "identity"]
    kernel_plans = tuple(plans[i] for i in kernel_idx)
    kernel_dims = tuple(irreps_outs[i].dim for i in kernel_idx)

    if use_pallas is None:
        # Tiny problems: plain XLA slicing beats custom-call + grid overhead.
        use_pallas = (n >= 2 * pack) and (n * d_in >= 1 << 14)

    if kernel_idx and use_pallas:
        # Per-row VMEM footprint is lane-padded to 128 regardless of d (<128).
        lane_pad = lambda d: ((d + 127) // 128) * 128
        per_row_vmem = (lane_pad(d_in) + sum(lane_pad(d) for d in kernel_dims)) * itemsize
        bt = _choose_batch_tile(n, per_row_vmem, pack, batch_tile)

        n_pad = pl.cdiv(n, bt) * bt
        x_in = x2 if n_pad == n else jnp.pad(x2, ((0, n_pad - n), (0, 0)))
        grid = (n_pad // bt,)

        # Headroom for double-buffering both the input and each output block.
        vmem_limit = int(min(96 << 20, max(32 << 20, 2.5 * bt * per_row_vmem)))

        kernel_out_shape = tuple(
            jax.ShapeDtypeStruct((n_pad, d), x.dtype) for d in kernel_dims
        )
        in_specs = [pl.BlockSpec((bt, d_in), lambda i: (i, 0))]
        out_specs = tuple(
            pl.BlockSpec((bt, d), lambda i: (i, 0)) for d in kernel_dims
        )

        kouts = pl.pallas_call(
            _make_extract_kernel(kernel_plans, kernel_dims),
            out_shape=kernel_out_shape,
            grid=grid,
            in_specs=in_specs,
            out_specs=out_specs,
            compiler_params=pltpu.CompilerParams(
                dimension_semantics=("parallel",),
                vmem_limit_bytes=vmem_limit,
            ),
        )(x_in)
        if not isinstance(kouts, (tuple, list)):
            kouts = (kouts,)
        kouts = [o[:n] for o in kouts]
    elif kernel_idx:
        # XLA fallback: static slices, fusable with neighboring ops.
        kouts = []
        for plan, d in zip(kernel_plans, kernel_dims):
            if _plan_fully_covers(plan, d):
                kouts.append(jnp.concatenate(
                    [x2[:, i1:i2] for (_, _, i1, i2) in plan], axis=-1))
            else:
                o = jnp.zeros((n, d), x.dtype)
                for (o1, o2, i1, i2) in plan:
                    o = o.at[:, o1:o2].set(x2[:, i1:i2])
                kouts.append(o)
    else:
        kouts = []

    # Stitch identity passthroughs and kernel outputs back in order.
    outs = []
    it = iter(kouts)
    for plan, ir in zip(plans, irreps_outs):
        if plan == "identity":
            outs.append(x)  # value-identical to torch's out[i][:] = x
        else:
            outs.append(next(it).reshape(lead_shape + (ir.dim,)))
    return tuple(outs)


# Pure-JAX reference (same semantics) for verification.
def extract_reference(x, irreps_in, irreps_outs, instructions):
    plans = build_extract_plan(irreps_in, irreps_outs, instructions)
    outs = []
    for ir, plan in zip(irreps_outs, plans):
        if plan == "identity":
            outs.append(x)
        else:
            o = jnp.zeros(x.shape[:-1] + (ir.dim,), x.dtype)
            for (o1, o2, i1, i2) in plan:
                o = o.at[..., o1:o2].set(x[..., i1:i2])
            outs.append(o)
    return tuple(outs)


if __name__ == "__main__":
    # irreps_in = 2x1e + 3x0e + 1x2e  -> channel dims [6, 3, 5], total 14
    irreps_in = Irreps([(2, 1), (3, 0), (1, 2)])
    # outputs:
    #   out0 = '3x0e'           <- instruction (1,)       (dim 3)
    #   out1 = '2x1e + 1x2e'    <- instruction (0, 2)     (dim 11, concat of two slices)
    #   out2 = full passthrough <- instruction (0, 1, 2)  (identity, wrapper short-circuit)
    irreps_outs = [
        Irreps([(3, 0)]),
        Irreps([(2, 1), (1, 2)]),
        Irreps([(2, 1), (3, 0), (1, 2)]),
    ]
    instructions = [(1,), (0, 2), (0, 1, 2)]

    key = jax.random.PRNGKey(0)
    x = jax.random.normal(key, (2, 64, irreps_in.dim), dtype=jnp.float32)

    outs = extract_pallas(x, irreps_in, irreps_outs, instructions, use_pallas=True)
    outs = jax.block_until_ready(outs)
    refs = extract_reference(x, irreps_in, irreps_outs, instructions)
    for o, r in zip(outs, refs):
        np.testing.assert_allclose(np.asarray(o), np.asarray(r), rtol=0, atol=0)

    # Ragged batch: exercises the pl.cdiv + pad tail path.
    x2 = jax.random.normal(jax.random.PRNGKey(1), (5, 13, irreps_in.dim),
                           dtype=jnp.float32)
    outs2 = jax.block_until_ready(
        extract_pallas(x2, irreps_in, irreps_outs, instructions, use_pallas=True))
    refs2 = extract_reference(x2, irreps_in, irreps_outs, instructions)
    for o, r in zip(outs2, refs2):
        np.testing.assert_allclose(np.asarray(o), np.asarray(r), rtol=0, atol=0)

    # Larger, tile-boundary-aligned batch to exercise the default tile chooser.
    x3 = jax.random.normal(jax.random.PRNGKey(2), (4, 512, irreps_in.dim),
                           dtype=jnp.float32)
    outs3 = jax.block_until_ready(
        extract_pallas(x3, irreps_in, irreps_outs, instructions))
    refs3 = extract_reference(x3, irreps_in, irreps_outs, instructions)
    for o, r in zip(outs3, refs3):
        np.testing.assert_allclose(np.asarray(o), np.asarray(r), rtol=0, atol=0)

    print("KERNEL_OK")
</pallas_src>

<mosaic_0001>
module attributes {stable_mosaic.version = 11 : i64} {
  func.func @kernel(%arg0: i32, %arg1: memref<64x14xf32, #tpu.memory_space<vmem>>, %arg2: memref<64x3xf32, #tpu.memory_space<vmem>>, %arg3: memref<64x11xf32, #tpu.memory_space<vmem>>) attributes {dimension_semantics = [#tpu.dimension_semantics<parallel>], iteration_bounds = array<i64: 2>, scalar_prefetch = 0 : i64, scratch_operands = 0 : i64, tpu.core_type = #tpu.core_type<tc>, window_params = [{transform_indices = @transform_0, window_bounds = array<i64: 64, 14>}, {transform_indices = @transform_1, window_bounds = array<i64: 64, 3>}, {transform_indices = @transform_2, window_bounds = array<i64: 64, 11>}]} {
    %c0 = arith.constant 0 : index
    %c6 = arith.constant 6 : index
    %0 = vector.load %arg1[%c0, %c6] : memref<64x14xf32, #tpu.memory_space<vmem>>, vector<64x3xf32>
    %c0_0 = arith.constant 0 : index
    %c0_1 = arith.constant 0 : index
    %1 = vector.load %arg2[%c0_0, %c0_1] : memref<64x3xf32, #tpu.memory_space<vmem>>, vector<64x3xf32>
    tpu.vector_store %arg2[%c0_0, %c0_1], %0 {strides = array<i32>} : memref<64x3xf32, #tpu.memory_space<vmem>>, vector<64x3xf32>,
    %c0_2 = arith.constant 0 : index
    %c0_3 = arith.constant 0 : index
    %2 = vector.load %arg1[%c0_2, %c0_3] : memref<64x14xf32, #tpu.memory_space<vmem>>, vector<64x6xf32>
    %c0_4 = arith.constant 0 : index
    %c9 = arith.constant 9 : index
    %3 = vector.load %arg1[%c0_4, %c9] : memref<64x14xf32, #tpu.memory_space<vmem>>, vector<64x5xf32>
    %4 = tpu.concatenate %2, %3 in 1 : vector<64x6xf32>, vector<64x5xf32> -> vector<64x11xf32>
    %c0_5 = arith.constant 0 : index
    %c0_6 = arith.constant 0 : index
    %5 = vector.load %arg3[%c0_5, %c0_6] : memref<64x11xf32, #tpu.memory_space<vmem>>, vector<64x11xf32>
    tpu.vector_store %arg3[%c0_5, %c0_6], %4 {strides = array<i32>} : memref<64x11xf32, #tpu.memory_space<vmem>>, vector<64x11xf32>,
    return
  }
  func.func @transform_0(%arg0: i32) -> (i32, i32) {
    %c0_i32 = arith.constant 0 : i32
    %c0_i32_0 = arith.constant 0 : i32
    return %arg0, %c0_i32 : i32, i32
  }
  func.func @transform_1(%arg0: i32) -> (i32, i32) {
    %c0_i32 = arith.constant 0 : i32
    %c0_i32_0 = arith.constant 0 : i32
    return %arg0, %c0_i32 : i32, i32
  }
  func.func @transform_2(%arg0: i32) -> (i32, i32) {
    %c0_i32 = arith.constant 0 : i32
    %c0_i32_0 = arith.constant 0 : i32
    return %arg0, %c0_i32 : i32, i32
  }
}

</mosaic_0001>

<bundles_post_ra>
// kernel: tpu_custom_call.1
= control target key start
LH: loop header
LB: loop body
LE: loop exit
PB: predicated region body
PF: predicated region fallthrough
CT: control target
= control target key end

     0   :  { %s406_s9 = smov 0   ;;  %s455_s0 = inlined_call_operand.vmem [shape: f32[128,14], index: 0, kind: input, shape index: {}]   ;;  %s456_s1 = inlined_call_operand.vmem [shape: f32[128,3], index: 1, kind: output, shape index: {0}]   ;;  %s457_s2 = inlined_call_operand.vmem [shape: f32[128,11], index: 2, kind: output, shape index: {1}]  }
   0x1 LB: > { %s358_s10 = sadd.s32 4294967295, %s387_s9   ;;  %p362_p0 = scmp.ge.s32.totalorder %s387_s9, 1  ;;  %s387_s9 = sphi %s406_s9, %s13_s9  }
   0x2   : > { %p116_p1 = scmp.lt.s32.totalorder %s387_s9, 3 }
   0x4   : > { %p117_p2 = pnand %p362_p0, %p116_p1 }
   0x5   : > { %s363_s11 = sshll.u32 (!%p117_p2), %s358_s10, 3  ;;  %s389_s16 = smov (!%p117_p2), 125  }
   0x6   : > { %120 = sbr.rel (%p117_p2) target bundleno = 159 (0x9f), region = 24  ;;  %p144_p3 = scmp.lt.s32.totalorder (!%p117_p2), %s363_s11, 15 }
   0x7   : > { %s390_s17 = smov (!%p117_p2), 122  }
   0xb   : > { %s459_s11 = smov (!%p144_p3, %s363_s11), 15  ;;  %vm250_vm0 = vcmask 48128   ;;  %vm259_vm1 = vcmask 89088   ;;  %vm201_vm2 = vcmask 23552  }
   0xc   : > { %s414_s12 = sshll.u32 %s459_s11, 3 }
   0xd   : > { %s147_s15 = scalar_lea.vmem %s455_s0, %s414_s12  ;;  %s159_s20 = scalar_lea.vmem %s457_s2, %s414_s12 }
   0xe   : > { %v212_v0 = vld [vmem:[%s147_s15 + $0x10] sm:$0xff]  ;;  %v210_v1 = vld [vmem:[%s147_s15] sm:$0xff]  ;;  %v213_v2 = vld [vmem:[%s147_s15 + $0x18] sm:$0xff]  ;;  %s153_s23 = scalar_lea.vmem %s456_s1, %s414_s12 }
   0xf   : > { %230 = vrot.lane.b32.xlu1 %v212_v0, %s389_s16  ;;  %226 = vrot.lane.b32.xlu0 %v210_v1, %s389_s16  ;;  %v211_v3 = vld [vmem:[%s147_s15 + $0x8] sm:$0xff]  ;;  %v214_v5 = vld [vmem:[%s147_s15 + $0x20] sm:$0xff] }
  0x10   : > { %v215_v4 = vld [vmem:[%s147_s15 + $0x28] sm:$0xff]  ;;  %v217_v6 = vld [vmem:[%s147_s15 + $0x38] sm:$0xff]  ;;  %v216_v7 = vld [vmem:[%s147_s15 + $0x30] sm:$0xff] }
  0x13   : > { %232 = vrot.lane.b32.xlu1 %v213_v2, %s389_s16  ;;  %228 = vrot.lane.b32.xlu0 %v211_v3, %s389_s16 }
  0x17   : > { %236 = vrot.lane.b32.xlu1 %v215_v4, %s389_s16  ;;  %234 = vrot.lane.b32.xlu0 %v214_v5, %s389_s16 }
  0x1b   : > { %240 = vrot.lane.b32.xlu1 %v217_v6, %s389_s16  ;;  %238 = vrot.lane.b32.xlu0 %v216_v7, %s389_s16 }
  0x1f   : > { %179 = vrot.lane.b32.xlu1 %v211_v3, %s390_s17  ;;  %177 = vrot.lane.b32.xlu0 %v210_v1, %s390_s17 }
  0x23   : > { %183 = vrot.lane.b32.xlu1 %v213_v2, %s390_s17  ;;  %181 = vrot.lane.b32.xlu0 %v212_v0, %s390_s17 }
  0x27   : > { %187 = vrot.lane.b32.xlu1 %v215_v4, %s390_s17  ;;  %185 = vrot.lane.b32.xlu0 %v214_v5, %s390_s17 }
  0x2b   : > { %191 = vrot.lane.b32.xlu1 %v217_v6, %s390_s17  ;;  %189 = vrot.lane.b32.xlu0 %v216_v7, %s390_s17 }
  0x81   : > { %v231_v8 = vpop.permute.xlu1 %230  ;;  %v227_v9 = vpop.permute.xlu0 %226 }
  0x82   : > { %v253_v10 = vsel %vm250_vm0, %v212_v0, %v231_v8  ;;  %v251_v11 = vsel %vm250_vm0, %v210_v1, %v227_v9 }
  0x83   : > { %262 = vst.msk [vmem:[%s159_s20 + $0x10] sm:$0xff] %vm259_vm1, %v253_v10  ;;  %260 = vst.msk [vmem:[%s159_s20] sm:$0xff] %vm259_vm1, %v251_v11 }
  0x85   : > { %v233_v12 = vpop.permute.xlu1 %232  ;;  %v229_v13 = vpop.permute.xlu0 %228 }
  0x86   : > { %v254_v14 = vsel %vm250_vm0, %v213_v2, %v233_v12  ;;  %v252_v15 = vsel %vm250_vm0, %v211_v3, %v229_v13 }
  0x87   : > { %263 = vst.msk [vmem:[%s159_s20 + $0x18] sm:$0xff] %vm259_vm1, %v254_v14  ;;  %261 = vst.msk [vmem:[%s159_s20 + $0x8] sm:$0xff] %vm259_vm1, %v252_v15 }
  0x89   : > { %v237_v16 = vpop.permute.xlu1 %236  ;;  %v235_v17 = vpop.permute.xlu0 %234 }
  0x8a   : > { %v256_v18 = vsel %vm250_vm0, %v215_v4, %v237_v16  ;;  %v255_v19 = vsel %vm250_vm0, %v214_v5, %v235_v17 }
  0x8b   : > { %265 = vst.msk [vmem:[%s159_s20 + $0x28] sm:$0xff] %vm259_vm1, %v256_v18  ;;  %264 = vst.msk [vmem:[%s159_s20 + $0x20] sm:$0xff] %vm259_vm1, %v255_v19 }
  0x8d   : > { %v241_v20 = vpop.permute.xlu1 %240  ;;  %v239_v21 = vpop.permute.xlu0 %238 }
  0x8e   : > { %v258_v22 = vsel %vm250_vm0, %v217_v6, %v241_v20  ;;  %v257_v23 = vsel %vm250_vm0, %v216_v7, %v239_v21 }
  0x8f   : > { %267 = vst.msk [vmem:[%s159_s20 + $0x38] sm:$0xff] %vm259_vm1, %v258_v22  ;;  %266 = vst.msk [vmem:[%s159_s20 + $0x30] sm:$0xff] %vm259_vm1, %v257_v23 }
  0x91   : > { %v180_v24 = vpop.permute.xlu1 %179  ;;  %v178_v25 = vpop.permute.xlu0 %177 }
  0x92   : > { %203 = vst.msk [vmem:[%s153_s23 + $0x8] sm:$0xff] %vm201_vm2, %v180_v24  ;;  %202 = vst.msk [vmem:[%s153_s23] sm:$0xff] %vm201_vm2, %v178_v25 }
  0x95   : > { %v184_v26 = vpop.permute.xlu1 %183  ;;  %v182_v27 = vpop.permute.xlu0 %181 }
  0x96   : > { %205 = vst.msk [vmem:[%s153_s23 + $0x18] sm:$0xff] %vm201_vm2, %v184_v26  ;;  %204 = vst.msk [vmem:[%s153_s23 + $0x10] sm:$0xff] %vm201_vm2, %v182_v27 }
  0x99   : > { %v188_v28 = vpop.permute.xlu1 %187  ;;  %v186_v29 = vpop.permute.xlu0 %185 }
  0x9a   : > { %207 = vst.msk [vmem:[%s153_s23 + $0x28] sm:$0xff] %vm201_vm2, %v188_v28  ;;  %206 = vst.msk [vmem:[%s153_s23 + $0x20] sm:$0xff] %vm201_vm2, %v186_v29 }
  0x9d   : > { %v192_v30 = vpop.permute.xlu1 %191  ;;  %v190_v31 = vpop.permute.xlu0 %189 }
  0x9e   : > { %209 = vst.msk [vmem:[%s153_s23 + $0x38] sm:$0xff] %vm201_vm2, %v192_v30  ;;  %208 = vst.msk [vmem:[%s153_s23 + $0x30] sm:$0xff] %vm201_vm2, %v190_v31 }
  0x9f PF: > { %s13_s9 = sadd.s32 1, %s387_s9  }
  0xa0   : > { %p10_p4 = scmp.ge.s32.totalorder %s13_s9, 4  }
  0xa2   :  { %12 = sbr.rel (!%p10_p4) target bundleno = 1 (0x1), region = 66 }

</bundles_post_ra>
